<compile_context>
chip_gen: v7x
topology: tpu7x:2x2x1
jax: 0.10.0
libtpu: 0.0.40
codegen_flags: <defaults>
</compile_context>

<pallas_src>
import functools

import jax
import jax.numpy as jnp
import numpy as np
from jax import lax
from jax.experimental import pallas as pl
from jax.experimental.pallas import tpu as pltpu

ELEM_LIST_LEN = 23
ATOM_FDIM = ELEM_LIST_LEN + 6 + 5 + 4 + 1   # 39
BOND_FDIM = 5 + 6                           # 11
MAX_NB = 6

LANE = 128
SUBLANE = 8


def _round_up(x, m):
    return (x + m - 1) // m * m


# ---------------------------------------------------------------------------
# Pallas kernel: full MPN forward (sparse message passing + readout + pooling).
# ---------------------------------------------------------------------------
def _mpn_kernel(depth, num_bonds, num_atoms,
                # scalar-prefetch (SMEM, int32, flattened [rows * MAX_NB]):
                bgraph_ref, agraph_ref,
                # VMEM inputs:
                fbonds_ref,    # [Bp, Kb]  bf16
                fatoms_ref,    # [Ap, Ka]  bf16
                scope_ref,     # [Mp, 3]   f32   (start, end, 1/len) per molecule
                wi_ref,        # [Kb, Hp]  bf16  (= W_i.T, zero-padded)
                wh_ref,        # [Hp, Hp]  bf16  (= W_h.T, zero-padded)
                wo_atom_ref,   # [Ka, Hp]  bf16  (= W_o[:, :AF].T, padded)
                wo_nei_ref,    # [Hp, Hp]  bf16  (= W_o[:, AF:].T, padded)
                bo_ref,        # [1, Hp]   f32
                # output:
                out_ref,       # [Mp, Hp]  f32
                # scratch:
                msg_ref,       # [Bp, Hp]  f32
                nei_b_ref,     # [Bp, Hp]  f32
                nei_a_ref):    # [Ap, Hp]  f32
    f32, bf16 = jnp.float32, jnp.bfloat16
    Mp = out_ref.shape[0]
    Ap = nei_a_ref.shape[0]

    # binput = W_i(fbonds); message = relu(binput)   (bf16 operands, f32 accum)
    binput = jnp.dot(fbonds_ref[...], wi_ref[...], preferred_element_type=f32)
    msg_ref[...] = jnp.maximum(binput, 0.0)

    # Padded gather-target rows stay exactly zero (never written by the gather).
    nei_b_ref[...] = jnp.zeros_like(nei_b_ref)
    nei_a_ref[...] = jnp.zeros_like(nei_a_ref)

    def gather_sum(graph_ref, n_rows, dst_ref):
        """dst[r] = sum_k message[graph[r, k]].  Indices (including padding
        index 0, whose message row is identically zero) reproduce the PyTorch
        index_select_ND(...).sum(dim=1) semantics exactly."""
        def body(r, carry):
            base = r * MAX_NB
            acc = msg_ref[pl.ds(graph_ref[base], 1), :]
            for k in range(1, MAX_NB):
                acc = acc + msg_ref[pl.ds(graph_ref[base + k], 1), :]
            dst_ref[pl.ds(r, 1), :] = acc
            return carry
        lax.fori_loop(0, n_rows, body, 0)

    # depth-1 rounds of bond message passing (strictly serial recurrence).
    for _ in range(depth - 1):
        gather_sum(bgraph_ref, num_bonds, nei_b_ref)
        nei_h = jnp.dot(nei_b_ref[...].astype(bf16), wh_ref[...],
                        preferred_element_type=f32)
        msg_ref[...] = jnp.maximum(binput + nei_h, 0.0)

    # Atom neighbourhood aggregation (sparse gather again).
    gather_sum(agraph_ref, num_atoms, nei_a_ref)

    # atom_hiddens = relu(W_o(cat([fatoms, nei_a], 1)) + b_o)
    #              = relu(fatoms @ Wo_atom + nei_a @ Wo_nei + b_o)
    # (W_o split keeps both operands lane-aligned; avoids an in-kernel concat.)
    atom_hiddens = jnp.maximum(
        jnp.dot(fatoms_ref[...], wo_atom_ref[...], preferred_element_type=f32)
        + jnp.dot(nei_a_ref[...].astype(bf16), wo_nei_ref[...],
                  preferred_element_type=f32)
        + bo_ref[...],
        0.0)

    # Per-molecule mean pooling: weights built in-kernel from the compact
    # (start, end, 1/len) descriptor -- no dense [M, A] scope matrix input.
    atom_idx = lax.broadcasted_iota(jnp.int32, (Mp, Ap), 1).astype(f32)
    starts = scope_ref[:, 0:1]
    ends = scope_ref[:, 1:2]
    inv_len = scope_ref[:, 2:3]
    weights = jnp.where((atom_idx >= starts) & (atom_idx < ends), inv_len, 0.0)
    out_ref[...] = jnp.dot(weights, atom_hiddens, preferred_element_type=f32)


# ---------------------------------------------------------------------------
# Glue: padding, descriptors, pallas_call wrapper.
# ---------------------------------------------------------------------------
def _pad2(a, rows, cols, dtype):
    out = jnp.zeros((rows, cols), dtype)
    return out.at[:a.shape[0], :a.shape[1]].set(a.astype(dtype))


def _flat_idx(graph):
    """Flatten an int neighbour table to 1-D int32 (SMEM-friendly layout)."""
    flat = np.asarray(graph, np.int32).reshape(-1)
    n = _round_up(int(flat.shape[0]), SUBLANE)
    out = np.zeros((n,), np.int32)
    out[:flat.shape[0]] = flat
    return jnp.asarray(out)


def mpn_forward(fatoms, fbonds, agraph, bgraph, scope, params, depth):
    """Pallas-backed MPN.forward -> mol_vecs [num_mols, hidden_size]."""
    Wi, Wh, Wo, bo = params["W_i"], params["W_h"], params["W_o"], params["b_o"]
    A = int(fatoms.shape[0])
    B = int(fbonds.shape[0])          # message rows (row 0 is the padding bond)
    H = int(Wi.shape[0])
    M = len(scope)
    AFBF = ATOM_FDIM + BOND_FDIM

    Hp = _round_up(H, 256) if H > LANE else _round_up(H, LANE)
    Kb = _round_up(AFBF, LANE)        # lane-dense K for W_i
    Ka = _round_up(ATOM_FDIM, LANE)   # lane-dense K for W_o (atom part)
    Ap = _round_up(A, SUBLANE)
    Bp = _round_up(B, SUBLANE)
    Mp = _round_up(M, SUBLANE)

    bf16, f32 = jnp.bfloat16, jnp.float32

    # --- operand prep: bf16 MXU operands, exact zero padding -----------------
    fbonds_p = _pad2(fbonds, Bp, Kb, bf16)
    fatoms_p = _pad2(fatoms, Ap, Ka, bf16)
    wi_t = _pad2(Wi.T, Kb, Hp, bf16)                           # [Kb, Hp]
    wh_t = _pad2(Wh.T, Hp, Hp, bf16)                           # [Hp, Hp]
    wo_atom = _pad2(Wo[:, :ATOM_FDIM].T, Ka, Hp, bf16)         # [Ka, Hp]
    wo_nei = _pad2(Wo[:, ATOM_FDIM:].T, Hp, Hp, bf16)          # [Hp, Hp]
    bo_row = _pad2(bo.reshape(1, H), 1, Hp, f32)               # [1, Hp]

    # Compact per-molecule pooling descriptor (start, end, 1/len).
    scope_np = np.zeros((Mp, 3), np.float32)
    for i, (st, le) in enumerate(scope):
        scope_np[i] = (float(st), float(st + le), 1.0 / float(le))
    scope_desc = jnp.asarray(scope_np)

    # Flattened neighbour tables for SMEM scalar prefetch (values are < B).
    bgraph_flat = _flat_idx(bgraph)
    agraph_flat = _flat_idx(agraph)

    vmem_args = (fbonds_p, fatoms_p, scope_desc, wi_t, wh_t,
                 wo_atom, wo_nei, bo_row)

    # --- generation-aware VMEM budget + cost estimate -------------------------
    def _nbytes(a):
        return int(np.prod(a.shape)) * a.dtype.itemsize

    in_bytes = sum(_nbytes(a) for a in vmem_args)
    out_bytes = Mp * Hp * 4
    scratch_bytes = (2 * Bp + Ap) * Hp * 4
    transient_bytes = (Bp + Ap) * Hp * 4 + Mp * Ap * 4   # binput, hiddens, pool weights
    resident = in_bytes + out_bytes + scratch_bytes + transient_bytes

    try:
        vmem_cap = int(pltpu.get_tpu_info().vmem_capacity_bytes)
    except Exception:
        vmem_cap = 64 * 2**20   # conservative fallback (v7x per-TC VMEM)
    budget = int(vmem_cap * 0.85)   # leave headroom for compiler-internal scratch
    if resident > budget:
        # TODO(synk): bond/atom-row tiled grid (pltpu.emit_pipeline) for batches
        # exceeding a single VMEM-resident pass.
        raise ValueError(f"MPN batch too large for single-pass kernel: "
                         f"{resident} bytes resident, budget {budget}")
    vmem_limit = int(min(budget, max(2 * resident, 8 * 2**20)))

    flops = (2 * (Bp * Kb * Hp
                  + (depth - 1) * Bp * Hp * Hp
                  + Ap * Ka * Hp + Ap * Hp * Hp
                  + Mp * Ap * Hp)
             + ((depth - 1) * B + A) * MAX_NB * Hp)          # gather adds
    bytes_accessed = (in_bytes + out_bytes
                      + _nbytes(bgraph_flat) + _nbytes(agraph_flat))

    def _full(shape):
        return pl.BlockSpec(shape, lambda i, *_: (0,) * len(shape))

    grid_spec = pltpu.PrefetchScalarGridSpec(
        num_scalar_prefetch=2,
        grid=(1,),
        in_specs=[_full(a.shape) for a in vmem_args],
        out_specs=_full((Mp, Hp)),
        scratch_shapes=[pltpu.VMEM((Bp, Hp), f32),    # message
                        pltpu.VMEM((Bp, Hp), f32),    # bond neighbour sums
                        pltpu.VMEM((Ap, Hp), f32)])   # atom neighbour sums

    out_p = pl.pallas_call(
        functools.partial(_mpn_kernel, depth, B, A),
        out_shape=jax.ShapeDtypeStruct((Mp, Hp), f32),
        grid_spec=grid_spec,
        compiler_params=pltpu.CompilerParams(
            dimension_semantics=("arbitrary",),
            vmem_limit_bytes=vmem_limit),
        cost_estimate=pl.CostEstimate(flops=int(flops), transcendentals=0,
                                      bytes_accessed=int(bytes_accessed)),
    )(bgraph_flat, agraph_flat, *vmem_args)
    return out_p[:M, :H]


# ---------------------------------------------------------------------------
# Pure-JAX reference mirroring the PyTorch MPN.forward (gather semantics).
# ---------------------------------------------------------------------------
def mpn_reference(fatoms, fbonds, agraph, bgraph, scope, params, depth):
    Wi, Wh, Wo, bo = params["W_i"], params["W_h"], params["W_o"], params["b_o"]
    binput = fbonds @ Wi.T
    message = jnp.maximum(binput, 0.0)
    for _ in range(depth - 1):
        nei = message[bgraph].sum(axis=1)
        nei = nei @ Wh.T
        message = jnp.maximum(binput + nei, 0.0)
    nei = message[agraph].sum(axis=1)
    ainput = jnp.concatenate([fatoms, nei], axis=1)
    atom_hiddens = jnp.maximum(ainput @ Wo.T + bo, 0.0)
    mol_vecs = [atom_hiddens[st:st + le].mean(axis=0) for st, le in scope]
    return jnp.stack(mol_vecs, axis=0)


# ---------------------------------------------------------------------------
# Main
# ---------------------------------------------------------------------------
if __name__ == "__main__":
    hidden_size = 32
    depth = 3

    scope = [(0, 7), (7, 6)]                    # two molecules, 13 atoms total
    num_atoms = sum(le for _, le in scope)      # 13
    num_bonds = 19                              # includes the index-0 padding bond

    key = jax.random.PRNGKey(0)
    keys = jax.random.split(key, 8)

    # Synthetic graph features / connectivity (same dtypes & shapes as tensorize()).
    fatoms = jax.random.normal(keys[0], (num_atoms, ATOM_FDIM), jnp.float32)
    fbonds = jax.random.normal(keys[1], (num_bonds, ATOM_FDIM + BOND_FDIM),
                               jnp.float32)
    fbonds = fbonds.at[0].set(0.0)   # index-0 padding bond row, as in MPN.tensorize
    agraph = jax.random.randint(keys[2], (num_atoms, MAX_NB), 0, num_bonds,
                                dtype=jnp.int32)
    bgraph = jax.random.randint(keys[3], (num_bonds, MAX_NB), 0, num_bonds,
                                dtype=jnp.int32)

    # Deterministic parameter init (shapes from MPN.__init__).
    scale = 0.1
    params = {
        "W_i": scale * jax.random.normal(
            keys[4], (hidden_size, ATOM_FDIM + BOND_FDIM), jnp.float32),
        "W_h": scale * jax.random.normal(
            keys[5], (hidden_size, hidden_size), jnp.float32),
        "W_o": scale * jax.random.normal(
            keys[6], (hidden_size, ATOM_FDIM + hidden_size), jnp.float32),
        "b_o": scale * jax.random.normal(keys[7], (hidden_size,), jnp.float32),
    }

    out = mpn_forward(fatoms, fbonds, agraph, bgraph, scope, params, depth)
    out = jax.block_until_ready(out)

    ref = mpn_reference(fatoms, fbonds, agraph, bgraph, scope, params, depth)
    assert out.shape == (len(scope), hidden_size)
    # bf16 MXU operands (f32 accumulation, f32 message carry) vs f32 reference.
    max_err = float(jnp.max(jnp.abs(out - ref)))
    assert jnp.allclose(out, ref, atol=5e-2, rtol=5e-2), f"max abs err {max_err}"

    print("KERNEL_OK")
</pallas_src>

<mosaic_0001>
module attributes {stable_mosaic.version = 11 : i64} {
  func.func @_mpn_kernel(%arg0: i32, %arg1: memref<120xi32, #tpu.memory_space<smem>>, %arg2: memref<80xi32, #tpu.memory_space<smem>>, %arg3: memref<24x128xbf16, #tpu.memory_space<vmem>>, %arg4: memref<16x128xbf16, #tpu.memory_space<vmem>>, %arg5: memref<8x3xf32, #tpu.memory_space<vmem>>, %arg6: memref<128x128xbf16, #tpu.memory_space<vmem>>, %arg7: memref<128x128xbf16, #tpu.memory_space<vmem>>, %arg8: memref<128x128xbf16, #tpu.memory_space<vmem>>, %arg9: memref<128x128xbf16, #tpu.memory_space<vmem>>, %arg10: memref<1x128xf32, #tpu.memory_space<vmem>>, %arg11: memref<8x128xf32, #tpu.memory_space<vmem>>, %arg12: memref<24x128xf32, #tpu.memory_space<vmem>>, %arg13: memref<24x128xf32, #tpu.memory_space<vmem>>, %arg14: memref<16x128xf32, #tpu.memory_space<vmem>>) attributes {dimension_semantics = [#tpu.dimension_semantics<arbitrary>], iteration_bounds = array<i64: 1>, scalar_prefetch = 2 : i64, scratch_operands = 3 : i64, tpu.core_type = #tpu.core_type<tc>, window_params = [{pipeline_mode = #tpu.pipeline_mode<synchronous>, transform_indices = @transform_0, window_bounds = array<i64: 24, 128>}, {pipeline_mode = #tpu.pipeline_mode<synchronous>, transform_indices = @transform_1, window_bounds = array<i64: 16, 128>}, {pipeline_mode = #tpu.pipeline_mode<synchronous>, transform_indices = @transform_2, window_bounds = array<i64: 8, 3>}, {pipeline_mode = #tpu.pipeline_mode<synchronous>, transform_indices = @transform_3, window_bounds = array<i64: 128, 128>}, {pipeline_mode = #tpu.pipeline_mode<synchronous>, transform_indices = @transform_4, window_bounds = array<i64: 128, 128>}, {pipeline_mode = #tpu.pipeline_mode<synchronous>, transform_indices = @transform_5, window_bounds = array<i64: 128, 128>}, {pipeline_mode = #tpu.pipeline_mode<synchronous>, transform_indices = @transform_6, window_bounds = array<i64: 128, 128>}, {pipeline_mode = #tpu.pipeline_mode<synchronous>, transform_indices = @transform_7, window_bounds = array<i64: 1, 128>}, {pipeline_mode = #tpu.pipeline_mode<synchronous>, transform_indices = @transform_8, window_bounds = array<i64: 8, 128>}]} {
    %c0 = arith.constant 0 : index
    %c0_0 = arith.constant 0 : index
    %0 = vector.load %arg3[%c0, %c0_0] : memref<24x128xbf16, #tpu.memory_space<vmem>>, vector<24x128xbf16>
    %c0_1 = arith.constant 0 : index
    %c0_2 = arith.constant 0 : index
    %1 = vector.load %arg6[%c0_1, %c0_2] : memref<128x128xbf16, #tpu.memory_space<vmem>>, vector<128x128xbf16>
    %cst = arith.constant dense<0.000000e+00> : vector<24x128xf32>
    %2 = tpu.matmul %0, %1, %cst {dimension_numbers = #tpu.dot_dimension_numbers<[1], [0], [0], [1], [0, 0, 1, 1], [], []>} : vector<24x128xbf16>, vector<128x128xbf16>, vector<24x128xf32> -> vector<24x128xf32>
    %cst_3 = arith.constant 0.000000e+00 : f32
    %3 = vector.broadcast %cst_3 : f32 to vector<24x128xf32>
    %4 = arith.maximumf %2, %3 : vector<24x128xf32>
    %c0_4 = arith.constant 0 : index
    %c0_5 = arith.constant 0 : index
    %5 = vector.load %arg12[%c0_4, %c0_5] : memref<24x128xf32, #tpu.memory_space<vmem>>, vector<24x128xf32>
    tpu.vector_store %arg12[%c0_4, %c0_5], %4 {strides = array<i32>} : memref<24x128xf32, #tpu.memory_space<vmem>>, vector<24x128xf32>,
    %cst_6 = arith.constant 0.000000e+00 : f32
    %6 = vector.broadcast %cst_6 : f32 to vector<24x128xf32>
    %c0_7 = arith.constant 0 : index
    %c0_8 = arith.constant 0 : index
    %7 = vector.load %arg13[%c0_7, %c0_8] : memref<24x128xf32, #tpu.memory_space<vmem>>, vector<24x128xf32>
    tpu.vector_store %arg13[%c0_7, %c0_8], %6 {strides = array<i32>} : memref<24x128xf32, #tpu.memory_space<vmem>>, vector<24x128xf32>,
    %cst_9 = arith.constant 0.000000e+00 : f32
    %8 = vector.broadcast %cst_9 : f32 to vector<16x128xf32>
    %c0_10 = arith.constant 0 : index
    %c0_11 = arith.constant 0 : index
    %9 = vector.load %arg14[%c0_10, %c0_11] : memref<16x128xf32, #tpu.memory_space<vmem>>, vector<16x128xf32>
    tpu.vector_store %arg14[%c0_10, %c0_11], %8 {strides = array<i32>} : memref<16x128xf32, #tpu.memory_space<vmem>>, vector<16x128xf32>,
    %c0_i32 = arith.constant 0 : i32
    %c19_i32 = arith.constant 19 : i32
    %10 = arith.addi %c0_i32, %c19_i32 : i32
    %c1_i32 = arith.constant 1 : i32
    scf.for %arg15 = %c0_i32 to %10 step %c1_i32  : i32 {
      %c6_i32 = arith.constant 6 : i32
      %58 = arith.muli %arg15, %c6_i32 : i32
      %59 = arith.index_cast %58 : i32 to index
      %60 = memref.load %arg1[%59] : memref<120xi32, #tpu.memory_space<smem>>
      %61 = arith.index_cast %60 : i32 to index
      %c0_57 = arith.constant 0 : index
      %62 = vector.load %arg12[%61, %c0_57] : memref<24x128xf32, #tpu.memory_space<vmem>>, vector<1x128xf32>
      %c1_i32_58 = arith.constant 1 : i32
      %63 = arith.addi %58, %c1_i32_58 : i32
      %64 = arith.index_cast %63 : i32 to index
      %65 = memref.load %arg1[%64] : memref<120xi32, #tpu.memory_space<smem>>
      %66 = arith.index_cast %65 : i32 to index
      %c0_59 = arith.constant 0 : index
      %67 = vector.load %arg12[%66, %c0_59] : memref<24x128xf32, #tpu.memory_space<vmem>>, vector<1x128xf32>
      %68 = arith.addf %62, %67 : vector<1x128xf32>
      %c2_i32 = arith.constant 2 : i32
      %69 = arith.addi %58, %c2_i32 : i32
      %70 = arith.index_cast %69 : i32 to index
      %71 = memref.load %arg1[%70] : memref<120xi32, #tpu.memory_space<smem>>
      %72 = arith.index_cast %71 : i32 to index
      %c0_60 = arith.constant 0 : index
      %73 = vector.load %arg12[%72, %c0_60] : memref<24x128xf32, #tpu.memory_space<vmem>>, vector<1x128xf32>
      %74 = arith.addf %68, %73 : vector<1x128xf32>
      %c3_i32 = arith.constant 3 : i32
      %75 = arith.addi %58, %c3_i32 : i32
      %76 = arith.index_cast %75 : i32 to index
      %77 = memref.load %arg1[%76] : memref<120xi32, #tpu.memory_space<smem>>
      %78 = arith.index_cast %77 : i32 to index
      %c0_61 = arith.constant 0 : index
      %79 = vector.load %arg12[%78, %c0_61] : memref<24x128xf32, #tpu.memory_space<vmem>>, vector<1x128xf32>
      %80 = arith.addf %74, %79 : vector<1x128xf32>
      %c4_i32 = arith.constant 4 : i32
      %81 = arith.addi %58, %c4_i32 : i32
      %82 = arith.index_cast %81 : i32 to index
      %83 = memref.load %arg1[%82] : memref<120xi32, #tpu.memory_space<smem>>
      %84 = arith.index_cast %83 : i32 to index
      %c0_62 = arith.constant 0 : index
      %85 = vector.load %arg12[%84, %c0_62] : memref<24x128xf32, #tpu.memory_space<vmem>>, vector<1x128xf32>
      %86 = arith.addf %80, %85 : vector<1x128xf32>
      %c5_i32 = arith.constant 5 : i32
      %87 = arith.addi %58, %c5_i32 : i32
      %88 = arith.index_cast %87 : i32 to index
      %89 = memref.load %arg1[%88] : memref<120xi32, #tpu.memory_space<smem>>
      %90 = arith.index_cast %89 : i32 to index
      %c0_63 = arith.constant 0 : index
      %91 = vector.load %arg12[%90, %c0_63] : memref<24x128xf32, #tpu.memory_space<vmem>>, vector<1x128xf32>
      %92 = arith.addf %86, %91 : vector<1x128xf32>
      %93 = arith.index_cast %arg15 : i32 to index
      %c0_64 = arith.constant 0 : index
      %94 = vector.load %arg13[%93, %c0_64] : memref<24x128xf32, #tpu.memory_space<vmem>>, vector<1x128xf32>
      tpu.vector_store %arg13[%93, %c0_64], %92 {strides = array<i32>} : memref<24x128xf32, #tpu.memory_space<vmem>>, vector<1x128xf32>,
    }
    %c19_i32_12 = arith.constant 19 : i32
    %c0_13 = arith.constant 0 : index
    %c0_14 = arith.constant 0 : index
    %11 = vector.load %arg13[%c0_13, %c0_14] : memref<24x128xf32, #tpu.memory_space<vmem>>, vector<24x128xf32>
    %12 = arith.truncf %11 : vector<24x128xf32> to vector<24x128xbf16>
    %c0_15 = arith.constant 0 : index
    %c0_16 = arith.constant 0 : index
    %13 = vector.load %arg7[%c0_15, %c0_16] : memref<128x128xbf16, #tpu.memory_space<vmem>>, vector<128x128xbf16>
    %cst_17 = arith.constant dense<0.000000e+00> : vector<24x128xf32>
    %14 = tpu.matmul %12, %13, %cst_17 {dimension_numbers = #tpu.dot_dimension_numbers<[1], [0], [0], [1], [0, 0, 1, 1], [], []>} : vector<24x128xbf16>, vector<128x128xbf16>, vector<24x128xf32> -> vector<24x128xf32>
    %15 = arith.addf %2, %14 : vector<24x128xf32>
    %cst_18 = arith.constant 0.000000e+00 : f32
    %16 = vector.broadcast %cst_18 : f32 to vector<24x128xf32>
    %17 = arith.maximumf %15, %16 : vector<24x128xf32>
    %c0_19 = arith.constant 0 : index
    %c0_20 = arith.constant 0 : index
    %18 = vector.load %arg12[%c0_19, %c0_20] : memref<24x128xf32, #tpu.memory_space<vmem>>, vector<24x128xf32>
    tpu.vector_store %arg12[%c0_19, %c0_20], %17 {strides = array<i32>} : memref<24x128xf32, #tpu.memory_space<vmem>>, vector<24x128xf32>,
    %c0_i32_21 = arith.constant 0 : i32
    %c19_i32_22 = arith.constant 19 : i32
    %19 = arith.addi %c0_i32_21, %c19_i32_22 : i32
    %c1_i32_23 = arith.constant 1 : i32
    scf.for %arg15 = %c0_i32_21 to %19 step %c1_i32_23  : i32 {
      %c6_i32 = arith.constant 6 : i32
      %58 = arith.muli %arg15, %c6_i32 : i32
      %59 = arith.index_cast %58 : i32 to index
      %60 = memref.load %arg1[%59] : memref<120xi32, #tpu.memory_space<smem>>
      %61 = arith.index_cast %60 : i32 to index
      %c0_57 = arith.constant 0 : index
      %62 = vector.load %arg12[%61, %c0_57] : memref<24x128xf32, #tpu.memory_space<vmem>>, vector<1x128xf32>
      %c1_i32_58 = arith.constant 1 : i32
      %63 = arith.addi %58, %c1_i32_58 : i32
      %64 = arith.index_cast %63 : i32 to index
      %65 = memref.load %arg1[%64] : memref<120xi32, #tpu.memory_space<smem>>
      %66 = arith.index_cast %65 : i32 to index
      %c0_59 = arith.constant 0 : index
      %67 = vector.load %arg12[%66, %c0_59] : memref<24x128xf32, #tpu.memory_space<vmem>>, vector<1x128xf32>
      %68 = arith.addf %62, %67 : vector<1x128xf32>
      %c2_i32 = arith.constant 2 : i32
      %69 = arith.addi %58, %c2_i32 : i32
      %70 = arith.index_cast %69 : i32 to index
      %71 = memref.load %arg1[%70] : memref<120xi32, #tpu.memory_space<smem>>
      %72 = arith.index_cast %71 : i32 to index
      %c0_60 = arith.constant 0 : index
      %73 = vector.load %arg12[%72, %c0_60] : memref<24x128xf32, #tpu.memory_space<vmem>>, vector<1x128xf32>
      %74 = arith.addf %68, %73 : vector<1x128xf32>
      %c3_i32 = arith.constant 3 : i32
      %75 = arith.addi %58, %c3_i32 : i32
      %76 = arith.index_cast %75 : i32 to index
      %77 = memref.load %arg1[%76] : memref<120xi32, #tpu.memory_space<smem>>
      %78 = arith.index_cast %77 : i32 to index
      %c0_61 = arith.constant 0 : index
      %79 = vector.load %arg12[%78, %c0_61] : memref<24x128xf32, #tpu.memory_space<vmem>>, vector<1x128xf32>
      %80 = arith.addf %74, %79 : vector<1x128xf32>
      %c4_i32 = arith.constant 4 : i32
      %81 = arith.addi %58, %c4_i32 : i32
      %82 = arith.index_cast %81 : i32 to index
      %83 = memref.load %arg1[%82] : memref<120xi32, #tpu.memory_space<smem>>
      %84 = arith.index_cast %83 : i32 to index
      %c0_62 = arith.constant 0 : index
      %85 = vector.load %arg12[%84, %c0_62] : memref<24x128xf32, #tpu.memory_space<vmem>>, vector<1x128xf32>
      %86 = arith.addf %80, %85 : vector<1x128xf32>
      %c5_i32 = arith.constant 5 : i32
      %87 = arith.addi %58, %c5_i32 : i32
      %88 = arith.index_cast %87 : i32 to index
      %89 = memref.load %arg1[%88] : memref<120xi32, #tpu.memory_space<smem>>
      %90 = arith.index_cast %89 : i32 to index
      %c0_63 = arith.constant 0 : index
      %91 = vector.load %arg12[%90, %c0_63] : memref<24x128xf32, #tpu.memory_space<vmem>>, vector<1x128xf32>
      %92 = arith.addf %86, %91 : vector<1x128xf32>
      %93 = arith.index_cast %arg15 : i32 to index
      %c0_64 = arith.constant 0 : index
      %94 = vector.load %arg13[%93, %c0_64] : memref<24x128xf32, #tpu.memory_space<vmem>>, vector<1x128xf32>
      tpu.vector_store %arg13[%93, %c0_64], %92 {strides = array<i32>} : memref<24x128xf32, #tpu.memory_space<vmem>>, vector<1x128xf32>,
    }
    %c19_i32_24 = arith.constant 19 : i32
    %c0_25 = arith.constant 0 : index
    %c0_26 = arith.constant 0 : index
    %20 = vector.load %arg13[%c0_25, %c0_26] : memref<24x128xf32, #tpu.memory_space<vmem>>, vector<24x128xf32>
    %21 = arith.truncf %20 : vector<24x128xf32> to vector<24x128xbf16>
    %c0_27 = arith.constant 0 : index
    %c0_28 = arith.constant 0 : index
    %22 = vector.load %arg7[%c0_27, %c0_28] : memref<128x128xbf16, #tpu.memory_space<vmem>>, vector<128x128xbf16>
    %cst_29 = arith.constant dense<0.000000e+00> : vector<24x128xf32>
    %23 = tpu.matmul %21, %22, %cst_29 {dimension_numbers = #tpu.dot_dimension_numbers<[1], [0], [0], [1], [0, 0, 1, 1], [], []>} : vector<24x128xbf16>, vector<128x128xbf16>, vector<24x128xf32> -> vector<24x128xf32>
    %24 = arith.addf %2, %23 : vector<24x128xf32>
    %cst_30 = arith.constant 0.000000e+00 : f32
    %25 = vector.broadcast %cst_30 : f32 to vector<24x128xf32>
    %26 = arith.maximumf %24, %25 : vector<24x128xf32>
    %c0_31 = arith.constant 0 : index
    %c0_32 = arith.constant 0 : index
    %27 = vector.load %arg12[%c0_31, %c0_32] : memref<24x128xf32, #tpu.memory_space<vmem>>, vector<24x128xf32>
    tpu.vector_store %arg12[%c0_31, %c0_32], %26 {strides = array<i32>} : memref<24x128xf32, #tpu.memory_space<vmem>>, vector<24x128xf32>,
    %c0_i32_33 = arith.constant 0 : i32
    %c13_i32 = arith.constant 13 : i32
    %28 = arith.addi %c0_i32_33, %c13_i32 : i32
    %c1_i32_34 = arith.constant 1 : i32
    scf.for %arg15 = %c0_i32_33 to %28 step %c1_i32_34  : i32 {
      %c6_i32 = arith.constant 6 : i32
      %58 = arith.muli %arg15, %c6_i32 : i32
      %59 = arith.index_cast %58 : i32 to index
      %60 = memref.load %arg2[%59] : memref<80xi32, #tpu.memory_space<smem>>
      %61 = arith.index_cast %60 : i32 to index
      %c0_57 = arith.constant 0 : index
      %62 = vector.load %arg12[%61, %c0_57] : memref<24x128xf32, #tpu.memory_space<vmem>>, vector<1x128xf32>
      %c1_i32_58 = arith.constant 1 : i32
      %63 = arith.addi %58, %c1_i32_58 : i32
      %64 = arith.index_cast %63 : i32 to index
      %65 = memref.load %arg2[%64] : memref<80xi32, #tpu.memory_space<smem>>
      %66 = arith.index_cast %65 : i32 to index
      %c0_59 = arith.constant 0 : index
      %67 = vector.load %arg12[%66, %c0_59] : memref<24x128xf32, #tpu.memory_space<vmem>>, vector<1x128xf32>
      %68 = arith.addf %62, %67 : vector<1x128xf32>
      %c2_i32 = arith.constant 2 : i32
      %69 = arith.addi %58, %c2_i32 : i32
      %70 = arith.index_cast %69 : i32 to index
      %71 = memref.load %arg2[%70] : memref<80xi32, #tpu.memory_space<smem>>
      %72 = arith.index_cast %71 : i32 to index
      %c0_60 = arith.constant 0 : index
      %73 = vector.load %arg12[%72, %c0_60] : memref<24x128xf32, #tpu.memory_space<vmem>>, vector<1x128xf32>
      %74 = arith.addf %68, %73 : vector<1x128xf32>
      %c3_i32 = arith.constant 3 : i32
      %75 = arith.addi %58, %c3_i32 : i32
      %76 = arith.index_cast %75 : i32 to index
      %77 = memref.load %arg2[%76] : memref<80xi32, #tpu.memory_space<smem>>
      %78 = arith.index_cast %77 : i32 to index
      %c0_61 = arith.constant 0 : index
      %79 = vector.load %arg12[%78, %c0_61] : memref<24x128xf32, #tpu.memory_space<vmem>>, vector<1x128xf32>
      %80 = arith.addf %74, %79 : vector<1x128xf32>
      %c4_i32 = arith.constant 4 : i32
      %81 = arith.addi %58, %c4_i32 : i32
      %82 = arith.index_cast %81 : i32 to index
      %83 = memref.load %arg2[%82] : memref<80xi32, #tpu.memory_space<smem>>
      %84 = arith.index_cast %83 : i32 to index
      %c0_62 = arith.constant 0 : index
      %85 = vector.load %arg12[%84, %c0_62] : memref<24x128xf32, #tpu.memory_space<vmem>>, vector<1x128xf32>
      %86 = arith.addf %80, %85 : vector<1x128xf32>
      %c5_i32 = arith.constant 5 : i32
      %87 = arith.addi %58, %c5_i32 : i32
      %88 = arith.index_cast %87 : i32 to index
      %89 = memref.load %arg2[%88] : memref<80xi32, #tpu.memory_space<smem>>
      %90 = arith.index_cast %89 : i32 to index
      %c0_63 = arith.constant 0 : index
      %91 = vector.load %arg12[%90, %c0_63] : memref<24x128xf32, #tpu.memory_space<vmem>>, vector<1x128xf32>
      %92 = arith.addf %86, %91 : vector<1x128xf32>
      %93 = arith.index_cast %arg15 : i32 to index
      %c0_64 = arith.constant 0 : index
      %94 = vector.load %arg14[%93, %c0_64] : memref<16x128xf32, #tpu.memory_space<vmem>>, vector<1x128xf32>
      tpu.vector_store %arg14[%93, %c0_64], %92 {strides = array<i32>} : memref<16x128xf32, #tpu.memory_space<vmem>>, vector<1x128xf32>,
    }
    %c13_i32_35 = arith.constant 13 : i32
    %c0_36 = arith.constant 0 : index
    %c0_37 = arith.constant 0 : index
    %29 = vector.load %arg4[%c0_36, %c0_37] : memref<16x128xbf16, #tpu.memory_space<vmem>>, vector<16x128xbf16>
    %c0_38 = arith.constant 0 : index
    %c0_39 = arith.constant 0 : index
    %30 = vector.load %arg8[%c0_38, %c0_39] : memref<128x128xbf16, #tpu.memory_space<vmem>>, vector<128x128xbf16>
    %cst_40 = arith.constant dense<0.000000e+00> : vector<16x128xf32>
    %31 = tpu.matmul %29, %30, %cst_40 {dimension_numbers = #tpu.dot_dimension_numbers<[1], [0], [0], [1], [0, 0, 1, 1], [], []>} : vector<16x128xbf16>, vector<128x128xbf16>, vector<16x128xf32> -> vector<16x128xf32>
    %c0_41 = arith.constant 0 : index
    %c0_42 = arith.constant 0 : index
    %32 = vector.load %arg14[%c0_41, %c0_42] : memref<16x128xf32, #tpu.memory_space<vmem>>, vector<16x128xf32>
    %33 = arith.truncf %32 : vector<16x128xf32> to vector<16x128xbf16>
    %c0_43 = arith.constant 0 : index
    %c0_44 = arith.constant 0 : index
    %34 = vector.load %arg9[%c0_43, %c0_44] : memref<128x128xbf16, #tpu.memory_space<vmem>>, vector<128x128xbf16>
    %cst_45 = arith.constant dense<0.000000e+00> : vector<16x128xf32>
    %35 = tpu.matmul %33, %34, %cst_45 {dimension_numbers = #tpu.dot_dimension_numbers<[1], [0], [0], [1], [0, 0, 1, 1], [], []>} : vector<16x128xbf16>, vector<128x128xbf16>, vector<16x128xf32> -> vector<16x128xf32>
    %36 = arith.addf %31, %35 : vector<16x128xf32>
    %c0_46 = arith.constant 0 : index
    %c0_47 = arith.constant 0 : index
    %37 = vector.load %arg10[%c0_46, %c0_47] : memref<1x128xf32, #tpu.memory_space<vmem>>, vector<1x128xf32>
    %38 = vector.broadcast %37 : vector<1x128xf32> to vector<16x128xf32>
    %39 = arith.addf %36, %38 : vector<16x128xf32>
    %cst_48 = arith.constant 0.000000e+00 : f32
    %40 = vector.broadcast %cst_48 : f32 to vector<16x128xf32>
    %41 = arith.maximumf %39, %40 : vector<16x128xf32>
    %42 = tpu.iota {dimensions = array<i32: 1>} : vector<8x16xi32>
    %43 = arith.sitofp %42 : vector<8x16xi32> to vector<8x16xf32>
    %c0_49 = arith.constant 0 : index
    %c0_50 = arith.constant 0 : index
    %44 = vector.load %arg5[%c0_49, %c0_50] : memref<8x3xf32, #tpu.memory_space<vmem>>, vector<8x1xf32>
    %c0_51 = arith.constant 0 : index
    %c1 = arith.constant 1 : index
    %45 = vector.load %arg5[%c0_51, %c1] : memref<8x3xf32, #tpu.memory_space<vmem>>, vector<8x1xf32>
    %c0_52 = arith.constant 0 : index
    %c2 = arith.constant 2 : index
    %46 = vector.load %arg5[%c0_52, %c2] : memref<8x3xf32, #tpu.memory_space<vmem>>, vector<8x1xf32>
    %47 = vector.broadcast %44 : vector<8x1xf32> to vector<8x16xf32>
    %48 = arith.cmpf oge, %43, %47 : vector<8x16xf32>
    %49 = vector.broadcast %45 : vector<8x1xf32> to vector<8x16xf32>
    %50 = arith.cmpf olt, %43, %49 : vector<8x16xf32>
    %51 = arith.andi %48, %50 : vector<8x16xi1>
    %cst_53 = arith.constant 0.000000e+00 : f32
    %52 = vector.shape_cast %46 : vector<8x1xf32> to vector<8x1xf32>
    %53 = vector.broadcast %52 : vector<8x1xf32> to vector<8x16xf32>
    %54 = vector.broadcast %cst_53 : f32 to vector<8x16xf32>
    %55 = arith.select %51, %53, %54 : vector<8x16xi1>, vector<8x16xf32>
    %cst_54 = arith.constant dense<0.000000e+00> : vector<8x128xf32>
    %56 = tpu.matmul %55, %41, %cst_54 {dimension_numbers = #tpu.dot_dimension_numbers<[1], [0], [0], [1], [0, 0, 1, 1], [], []>} : vector<8x16xf32>, vector<16x128xf32>, vector<8x128xf32> -> vector<8x128xf32>
    %c0_55 = arith.constant 0 : index
    %c0_56 = arith.constant 0 : index
    %57 = vector.load %arg11[%c0_55, %c0_56] : memref<8x128xf32, #tpu.memory_space<vmem>>, vector<8x128xf32>
    tpu.vector_store %arg11[%c0_55, %c0_56], %56 {strides = array<i32>} : memref<8x128xf32, #tpu.memory_space<vmem>>, vector<8x128xf32>,
    return
  }
  func.func @transform_0(%arg0: i32, %arg1: memref<120xi32, #tpu.memory_space<smem>>, %arg2: memref<80xi32, #tpu.memory_space<smem>>) -> (i32, i32) {
    %c0_i32 = arith.constant 0 : i32
    %c0_i32_0 = arith.constant 0 : i32
    %c0_i32_1 = arith.constant 0 : i32
    return %c0_i32, %c0_i32_0 : i32, i32
  }
  func.func @transform_1(%arg0: i32, %arg1: memref<120xi32, #tpu.memory_space<smem>>, %arg2: memref<80xi32, #tpu.memory_space<smem>>) -> (i32, i32) {
    %c0_i32 = arith.constant 0 : i32
    %c0_i32_0 = arith.constant 0 : i32
    %c0_i32_1 = arith.constant 0 : i32
    return %c0_i32, %c0_i32_0 : i32, i32
  }
  func.func @transform_2(%arg0: i32, %arg1: memref<120xi32, #tpu.memory_space<smem>>, %arg2: memref<80xi32, #tpu.memory_space<smem>>) -> (i32, i32) {
    %c0_i32 = arith.constant 0 : i32
    %c0_i32_0 = arith.constant 0 : i32
    %c0_i32_1 = arith.constant 0 : i32
    return %c0_i32, %c0_i32_0 : i32, i32
  }
  func.func @transform_3(%arg0: i32, %arg1: memref<120xi32, #tpu.memory_space<smem>>, %arg2: memref<80xi32, #tpu.memory_space<smem>>) -> (i32, i32) {
    %c0_i32 = arith.constant 0 : i32
    %c0_i32_0 = arith.constant 0 : i32
    %c0_i32_1 = arith.constant 0 : i32
    return %c0_i32, %c0_i32_0 : i32, i32
  }
  func.func @transform_4(%arg0: i32, %arg1: memref<120xi32, #tpu.memory_space<smem>>, %arg2: memref<80xi32, #tpu.memory_space<smem>>) -> (i32, i32) {
    %c0_i32 = arith.constant 0 : i32
    %c0_i32_0 = arith.constant 0 : i32
    %c0_i32_1 = arith.constant 0 : i32
    return %c0_i32, %c0_i32_0 : i32, i32
  }
  func.func @transform_5(%arg0: i32, %arg1: memref<120xi32, #tpu.memory_space<smem>>, %arg2: memref<80xi32, #tpu.memory_space<smem>>) -> (i32, i32) {
    %c0_i32 = arith.constant 0 : i32
    %c0_i32_0 = arith.constant 0 : i32
    %c0_i32_1 = arith.constant 0 : i32
    return %c0_i32, %c0_i32_0 : i32, i32
  }
  func.func @transform_6(%arg0: i32, %arg1: memref<120xi32, #tpu.memory_space<smem>>, %arg2: memref<80xi32, #tpu.memory_space<smem>>) -> (i32, i32) {
    %c0_i32 = arith.constant 0 : i32
    %c0_i32_0 = arith.constant 0 : i32
    %c0_i32_1 = arith.constant 0 : i32
    return %c0_i32, %c0_i32_0 : i32, i32
  }
  func.func @transform_7(%arg0: i32, %arg1: memref<120xi32, #tpu.memory_space<smem>>, %arg2: memref<80xi32, #tpu.memory_space<smem>>) -> (i32, i32) {
    %c0_i32 = arith.constant 0 : i32
    %c0_i32_0 = arith.constant 0 : i32
    %c0_i32_1 = arith.constant 0 : i32
    return %c0_i32, %c0_i32_0 : i32, i32
  }
  func.func @transform_8(%arg0: i32, %arg1: memref<120xi32, #tpu.memory_space<smem>>, %arg2: memref<80xi32, #tpu.memory_space<smem>>) -> (i32, i32) {
    %c0_i32 = arith.constant 0 : i32
    %c0_i32_0 = arith.constant 0 : i32
    %c0_i32_1 = arith.constant 0 : i32
    return %c0_i32, %c0_i32_0 : i32, i32
  }
}

</mosaic_0001>

<bundles_post_ra>
// kernel: tpu_custom_call.1
= control target key start
LH: loop header
LB: loop body
LE: loop exit
PB: predicated region body
PF: predicated region fallthrough
CT: control target
= control target key end

     0   :  { %s1687_s0 = inlined_call_operand.vmem [shape: s32[120], index: 0, kind: input, shape index: {}]   ;;  %s1688_s2 = inlined_call_operand.vmem [shape: bf16[24,128], index: 2, kind: input, shape index: {}]   ;;  %s1689_s3 = inlined_call_operand.vmem [shape: bf16[16,128], index: 3, kind: input, shape index: {}]   ;;  %s1690_s4 = inlined_call_operand.vmem [shape: f32[8,3], index: 4, kind: input, shape index: {}]   ;;  %s1691_s5 = inlined_call_operand.hbm [shape: bf16[128,128], index: 5, kind: input, shape index: {}]   ;;  %s1692_s6 = inlined_call_operand.hbm [shape: bf16[128,128], index: 6, kind: input, shape index: {}]   ;;  %s1693_s7 = inlined_call_operand.hbm [shape: bf16[128,128], index: 7, kind: input, shape index: {}]   ;;  %s1694_s8 = inlined_call_operand.hbm [shape: bf16[128,128], index: 8, kind: input, shape index: {}]   ;;  %s1695_s9 = inlined_call_operand.vmem [shape: f32[1,128], index: 9, kind: input, shape index: {}]   ;;  %s1696_s10 = inlined_call_operand.hbm [shape: f32[8,128], index: 10, kind: output, shape index: {}]   ;;  %s1697_s1 = inlined_call_operand.vmem [shape: s32[80], index: 1, kind: input, shape index: {}]  }
   0x1   :  { %s15_s15 = sshll.u32 %s1687_s0, 4  ;;  %s19_s18 = sshll.u32 %s1697_s1, 4  ;;  %s16_s15 = int_to_ptr.vmem [resolvable:$true] %s15_s15  ;;  %s20_s18 = int_to_ptr.vmem [resolvable:$true] %s19_s18 }
   0x2   :  { %s1270_s19 = scalar_lea.vmem %s16_s15, 16  ;;  %p1275_p1 = scmp.lt.s32.totalorder %s16_s15, %s16_s15 }
   0x3   :  { %p1271_p0 = scmp.ne.s32.totalorder %s16_s15, %s1270_s19  ;;  %p1276_p2 = scmp.lt.s32.totalorder %s1270_s19, %s1270_s19 }
   0x5   :  { %p1277_p3 = por %p1276_p2, %p1275_p1 }
   0x7   :  { %p1278_p4 = pnand %p1277_p3, %p1271_p0 }
   0x9   :  { %1281 = shalt.err (!%p1278_p4)  }
   0xa   :  { %s1438_s20 = smov [#allocation6]   ;;  %s1282_s21 = scalar_lea.vmem %s20_s18, 16 }
   0xb   :  { %18 = dma.vmem_to_smem %s16_s15, 16, %s1438_s20, [#allocation5] }
   0xc   :  { %p1283_p5 = scmp.ne.s32.totalorder %s20_s18, %s1282_s21  ;;  %p1287_p6 = scmp.lt.s32.totalorder %s20_s18, %s20_s18 }
   0xd   :  { %p1288_p7 = scmp.lt.s32.totalorder %s1282_s21, %s1282_s21 }
   0xf   :  { %p1289_p8 = por %p1288_p7, %p1287_p6 }
  0x11   :  { %p1290_p9 = pnand %p1289_p8, %p1283_p5 }
  0x13   :  { %1293 = shalt.err (!%p1290_p9)  }
  0x14   :  { %s1439_s0 = smov [#allocation7]  }
  0x15   :  { %22 = dma.vmem_to_smem %s20_s18, 16, %s1439_s0, [#allocation5] }
  0x16   :  { %1416 = dma.done.wait [#allocation5], 32 }
  0x17   :  { %1417 = vsyncadd [#allocation5], 4294967264 }
  0x18   :  { %24 = sfence }
  0x19   :  { %25 = vsyncpa [#allocation9], 0 }
  0x1a   :  { %26 = vsyncpa [#allocation12], 0 }
  0x1b   :  { %27 = vsyncpa [#allocation15], 0 }
  0x1c   :  { %28 = vsyncpa [#allocation10], 0  ;;  %s1440_s1 = smov [#allocation11]   ;;  %s1441_s23 = smov [#allocation8]  }
  0x1d   :  { %s52_s22 = sshll.u32 %s1440_s1, 4  ;;  %s40_s24 = sshll.u32 %s1441_s23, 4  ;;  %s53_s22 = int_to_ptr.vmem [resolvable:$true] %s52_s22  ;;  %s1514_s24 = int_to_ptr.vmem [resolvable:$true] %s40_s24 }
  0x1e   :  { %s1294_s27 = scalar_lea.hbm %s1692_s6, 1024 }
  0x1f   :  { %p1295_p10 = scmp.ne.s32.totalorder %s1692_s6, %s1294_s27  ;;  %p1298_p11 = scmp.lt.u32.totalorder %s1294_s27, %s1692_s6 }
  0x21   :  { %p1300_p12 = pnand %p1298_p11, %p1295_p10 }
  0x23   :  { %1303 = shalt.err (!%p1300_p12)
}
  0x24   :  { %s1304_s12 = scalar_lea.vmem %s53_s22, 1024  ;;  %p1309_p0 = scmp.lt.s32.totalorder %s53_s22, %s53_s22 }
  0x25   :  { %p1305_p13 = scmp.ne.s32.totalorder %s53_s22, %s1304_s12  ;;  %p1310_p1 = scmp.lt.s32.totalorder %s1304_s12, %s1304_s12 }
  0x27   :  { %p1311_p2 = por %p1310_p1, %p1309_p0 }
  0x29   :  { %p1312_p3 = pnand %p1311_p2, %p1305_p13 }
  0x2b   :  { %1315 = shalt.err (!%p1312_p3)
}
  0x2c   :  { %s1442_s13 = smov 64   ;;  %s1443_s14 = smov 4  }
  0x2d   :  { %58 = dma.hbm_to_vmem [thread:$0]  %s1692_s6, 1024, %s53_s22, [#allocation12], %s1442_s13, %s1442_s13, %s1443_s14  }
  0x2e   :  { %s1316_s19 = scalar_lea.hbm %s1691_s5, 1024 }
  0x2f   :  { %p1317_p4 = scmp.ne.s32.totalorder %s1691_s5, %s1316_s19  ;;  %p1320_p5 = scmp.lt.u32.totalorder %s1316_s19, %s1691_s5 }
  0x31   :  { %p1322_p6 = pnand %p1320_p5, %p1317_p4 }
  0x33   :  { %1325 = shalt.err (!%p1322_p6)
}
  0x34   :  { %s1326_s23 = scalar_lea.vmem %s1514_s24, 1024  ;;  %p1331_p8 = scmp.lt.s32.totalorder %s1514_s24, %s1514_s24 }
  0x35   :  { %p1327_p7 = scmp.ne.s32.totalorder %s1514_s24, %s1326_s23  ;;  %p1332_p9 = scmp.lt.s32.totalorder %s1326_s23, %s1326_s23 }
  0x37   :  { %p1333_p10 = por %p1332_p9, %p1331_p8 }
  0x39   :  { %p1334_p11 = pnand %p1333_p10, %p1327_p7 }
  0x3b   :  { %1337 = shalt.err (!%p1334_p11)
}
  0x3c   :  { %46 = dma.hbm_to_vmem [thread:$0]  %s1691_s5, 1024, %s1514_s24, [#allocation9], %s1442_s13, %s1442_s13, %s1443_s14  }
  0x3d   :  { %s1444_s25 = smov [#allocation13]   ;;  %s1445_s27 = smov [#allocation14]  }
  0x3e   :  { %s64_s26 = sshll.u32 %s1444_s25, 4  ;;  %s76_s28 = sshll.u32 %s1445_s27, 4  ;;  %s65_s26 = int_to_ptr.vmem [resolvable:$true] %s64_s26  ;;  %s1551_s28 = int_to_ptr.vmem [resolvable:$true] %s76_s28 }
  0x3f   :  { %s1338_s11 = scalar_lea.hbm %s1693_s7, 1024 }
  0x40   :  { %p1339_p12 = scmp.ne.s32.totalorder %s1693_s7, %s1338_s11  ;;  %p1342_p13 = scmp.lt.u32.totalorder %s1338_s11, %s1693_s7 }
  0x42   :  { %p1344_p0 = pnand %p1342_p13, %p1339_p12 }
  0x44   :  { %1347 = shalt.err (!%p1344_p0)
}
  0x45   :  { %s1348_s5 = scalar_lea.vmem %s65_s26, 1024  ;;  %p1353_p2 = scmp.lt.s32.totalorder %s65_s26, %s65_s26 }
  0x46   :  { %p1349_p1 = scmp.ne.s32.totalorder %s65_s26, %s1348_s5  ;;  %p1354_p3 = scmp.lt.s32.totalorder %s1348_s5, %s1348_s5 }
  0x48   :  { %p1355_p4 = por %p1354_p3, %p1353_p2 }
  0x4a   :  { %p1356_p5 = pnand %p1355_p4, %p1349_p1 }
  0x4c   :  { %1359 = shalt.err (!%p1356_p5)
}
  0x4d   :  { %70 = dma.hbm_to_vmem [thread:$0]  %s1693_s7, 1024, %s65_s26, [#allocation12], %s1442_s13, %s1442_s13, %s1443_s14  }
  0x4e   :  { %s1360_s21 = scalar_lea.hbm %s1694_s8, 1024 }
  0x4f   :  { %p1361_p6 = scmp.ne.s32.totalorder %s1694_s8, %s1360_s21  ;;  %p1364_p7 = scmp.lt.u32.totalorder %s1360_s21, %s1694_s8 }
  0x51   :  { %p1366_p8 = pnand %p1364_p7, %p1361_p6 }
  0x53   :  { %1369 = shalt.err (!%p1366_p8)
}
  0x54   :  { %s1370_s22 = scalar_lea.vmem %s1551_s28, 1024  ;;  %p1375_p10 = scmp.lt.s32.totalorder %s1551_s28, %s1551_s28 }
  0x55   :  { %p1371_p9 = scmp.ne.s32.totalorder %s1551_s28, %s1370_s22  ;;  %p1376_p11 = scmp.lt.s32.totalorder %s1370_s22, %s1370_s22 }
  0x57   :  { %p1377_p12 = por %p1376_p11, %p1375_p10 }
  0x59   :  { %p1378_p13 = pnand %p1377_p12, %p1371_p9 }
  0x5b   :  { %1381 = shalt.err (!%p1378_p13)
}
  0x5c   :  { %82 = dma.hbm_to_vmem [thread:$0]  %s1694_s8, 1024, %s1551_s28, [#allocation15], %s1442_s13, %s1442_s13, %s1443_s14  }
  0x5d   :  { %1418 = dma.done.wait [#allocation9], 1024  }
  0x5e   :  { %1419 = vsyncadd [#allocation9], 4294966272 }
  0x5f   :  { %1420 = dma.done.wait [#allocation12], 2048  }
  0x60   :  { %1421 = vsyncadd [#allocation12], 4294965248 }
  0x61   :  { %1422 = dma.done.wait [#allocation15], 1024  }
  0x62   :  { %1423 = vsyncadd [#allocation15], 4294966272  ;;  %v1446_v0 = vmov 0.0   ;;  %v1223_v1 = vld [vmem:[#allocation8] sm:$0xff]   ;;  %v1224_v2 = vld [vmem:[#allocation8 + $0x8] sm:$0xff]   ;;  %s1608_s27 = smov 0  }
  0x63   :  { %229 = vst [vmem:[#allocation3] sm:$0xff] %v1446_v0  ;;  %230 = vst [vmem:[#allocation3 + $0x8] sm:$0xff] %v1446_v0  ;;  %1074 = vmatprep.subr.bf16.mxu0 %v1223_v1  ;;  %v1225_v3 = vld [vmem:[#allocation8 + $0x10] sm:$0xff]   ;;  %v1226_v4 = vld [vmem:[#allocation8 + $0x18] sm:$0xff]  }
  0x64   :  { %231 = vst [vmem:[#allocation3 + $0x10] sm:$0xff] %v1446_v0  ;;  %232 = vst [vmem:[#allocation4] sm:$0xff] %v1446_v0  ;;  %1075 = vmatpush3.bf16.msra.mxu0 %v1223_v1  ;;  %v1231_v5 = vld [vmem:[%s1688_s2] sm:$0xff]   ;;  %v1228_v7 = vld [vmem:[#allocation8 + $0x28] sm:$0xff]  }
  0x65   :  { %233 = vst [vmem:[#allocation4 + $0x8] sm:$0xff] %v1446_v0  ;;  %1076 = vmatprep.subr.bf16.mxu0 %v1224_v2  ;;  %1090 = vmatprep.mubr.bf16.mxu0 %v1231_v5  ;;  %v1227_v6 = vld [vmem:[#allocation8 + $0x20] sm:$0xff]   ;;  %v1229_v8 = vld [vmem:[#allocation8 + $0x30] sm:$0xff]   ;;  %v1230_v9 = vld [vmem:[#allocation8 + $0x38] sm:$0xff]  }
  0x66   :  { %v1232_v10 = vld [vmem:[%s1688_s2 + $0x8] ss:$0 sps:$4 sm:$0xff]  }
  0x68   :  { %1077 = vmatpush3.bf16.msra.mxu0 %v1224_v2 }
  0x69   :  { %1078 = vmatprep.subr.bf16.mxu0 %v1225_v3 }
  0x6c   :  { %1079 = vmatpush3.bf16.msra.mxu0 %v1225_v3 }
  0x6d   :  { %1080 = vmatprep.subr.bf16.mxu0 %v1226_v4 }
  0x70   :  { %1081 = vmatpush3.bf16.msra.mxu0 %v1226_v4 }
  0x71   :  { %1082 = vmatprep.subr.bf16.mxu0 %v1227_v6 }
  0x74   :  { %1083 = vmatpush3.bf16.msra.mxu0 %v1227_v6 }
  0x75   :  { %1084 = vmatprep.subr.bf16.mxu0 %v1228_v7 }
  0x78   :  { %1085 = vmatpush3.bf16.msra.mxu0 %v1228_v7 }
  0x79   :  { %1086 = vmatprep.subr.bf16.mxu0 %v1229_v8 }
  0x7c   :  { %1087 = vmatpush3.bf16.msra.mxu0 %v1229_v8 }
  0x7d   :  { %1088 = vmatprep.subr.bf16.mxu0 %v1230_v9 }
  0x80   :  { %1089 = vmatpush3.bf16.msra.mxu0 %v1230_v9 }
  0x83   :  { %1091 = vmatmul.mubr.bf16.vlgmr.msra.gmra.mrb[0].mxu0 %v1232_v10 }
 0x156   :  { %v1599_v11 = vpop.f32.mrb[0].mxu0 }
 0x157   :  { %v225_v12 = vmax.f32 %v1599_v11, 0.0  ;;  %v1602_v13 = vpop.f32.mrb[1].mxu0 }
 0x158   :  { %v223_v14 = vmax.f32 %v1602_v13, 0.0  ;;  %v1093_v15 = vpop.f32.mrb[2].mxu0 }
 0x159   :  { %228 = vst [vmem:[#allocation2 + $0x10] sm:$0xff] %v225_v12  ;;  %v1605_v16 = vpop.f32.mrb[3].mxu0 }
 0x15a   :  { %226 = vst [vmem:[#allocation2] sm:$0xff] %v223_v14  ;;  %v224_v17 = vmax.f32 %v1605_v16, 0.0 }
 0x15c   :  { %227 = vst [vmem:[#allocation2 + $0x8] sm:$0xff] %v224_v17 }
 0x15d LB: > { %s240_s2 = smul.u32 6, %s1428_s27  ;;  %s269_s6 = scalar_lea.vmem [#allocation3], %s1428_s27  ;;  %s1428_s27 = sphi %s1608_s27, %s239_s27  }
 0x15e   : > { %s239_s27 = sadd.s32 1, %s1428_s27  }
 0x15f   : > { %s241_s28 = sld [smem:[#allocation6 + %s240_s2]]  ;;  %s244_s29 = sadd.s32 1, %s240_s2 }
 0x160   : > { %s245_s30 = sld [smem:[#allocation6 + %s244_s29]]  ;;  %s249_s11 = sadd.s32 2, %s240_s2 }
 0x161   : > { %s250_s12 = sld [smem:[#allocation6 + %s249_s11]]  ;;  %s254_s15 = sadd.s32 3, %s240_s2 }
 0x162   : > { %s255_s16 = sld [smem:[#allocation6 + %s254_s15]]  ;;  %s259_s17 = sadd.s32 4, %s240_s2 }
 0x163   : > { %s260_s5 = sld [smem:[#allocation6 + %s259_s17]]  ;;  %s264_s24 = sadd.s32 5, %s240_s2 }
 0x164   : > { %s265_s18 = sld [smem:[#allocation6 + %s264_s24]]  ;;  %p236_p0 = scmp.ge.s32.totalorder %s239_s27, 19  }
 0x165   : > { %s242_s19 = scalar_lea.vmem [#allocation2], %s241_s28  ;;  %v1233_v29 = vld [vmem:[#allocation11] sm:$0xff] (%p236_p0)   ;;  %v1234_v30 = vld [vmem:[#allocation11 + $0x8] sm:$0xff] (%p236_p0)   ;;  %v1235_v31 = vld [vmem:[#allocation11 + $0x10] sm:$0xff] (%p236_p0)   ;;  %s1621_s22 = smov (%p236_p0), 0  }
 0x166   : > { %v243_v18 = vld [vmem:[%s242_s19] sm:$0x1]  ;;  %s246_s20 = scalar_lea.vmem [#allocation2], %s245_s30  ;;  %1094 = vmatprep.subr.bf16.mxu1 (%p236_p0), %v1233_v29  ;;  %v1236_v32 = vld [vmem:[#allocation11 + $0x18] sm:$0xff] (%p236_p0)   ;;  %v1238_v37 = vld [vmem:[#allocation11 + $0x28] sm:$0xff] (%p236_p0)  }
 0x167   : > { %v247_v19 = vld [vmem:[%s246_s20] sm:$0x1]  ;;  %s251_s21 = scalar_lea.vmem [#allocation2], %s250_s12  ;;  %1095 = vmatpush3.bf16.msra.mxu1 (%p236_p0), %v1233_v29  ;;  %v1239_v38 = vld [vmem:[#allocation11 + $0x30] sm:$0xff] (%p236_p0)   ;;  %v1240_v39 = vld [vmem:[#allocation11 + $0x38] sm:$0xff] (%p236_p0)  }
 0x168   : > { %v248_v20 = vadd.f32 %v247_v19, %v243_v18  ;;  %v252_v21 = vld [vmem:[%s251_s21] sm:$0x1]  ;;  %s256_s0 = scalar_lea.vmem [#allocation2], %s255_s16  ;;  %1096 = vmatprep.subr.bf16.mxu1 (%p236_p0), %v1234_v30 }
 0x169   : > { %v257_v22 = vld [vmem:[%s256_s0] sm:$0x1]  ;;  %s261_s1 = scalar_lea.vmem [#allocation2], %s260_s5 }
 0x16a   : > { %v253_v23 = vadd.f32 %v252_v21, %v248_v20  ;;  %v262_v24 = vld [vmem:[%s261_s1] sm:$0x1]  ;;  %s266_s23 = scalar_lea.vmem [#allocation2], %s265_s18 }
 0x16b   : > { %v267_v26 = vld [vmem:[%s266_s23] sm:$0x1]  ;;  %1097 = vmatpush3.bf16.msra.mxu1 (%p236_p0), %v1234_v30 }
 0x16c   : > { %v258_v25 = vadd.f32 %v257_v22, %v253_v23  ;;  %238 = sbr.rel (!%p236_p0) target bundleno = 349 (0x15d), region = 110  ;;  %1098 = vmatprep.subr.bf16.mxu1 (%p236_p0), %v1235_v31  ;;  %v1237_v36 = vld [vmem:[#allocation11 + $0x20] sm:$0xff] (%p236_p0)  }
 0x16e   : > { %v263_v27 = vadd.f32 %v262_v24, %v258_v25 }
 0x16f   :  { %1099 = vmatpush3.bf16.msra.mxu1 (%p236_p0), %v1235_v31 }
 0x170   : > { %v268_v28 = vadd.f32 %v267_v26, %v263_v27  ;;  %1100 = vmatprep.subr.bf16.mxu1 (%p236_p0), %v1236_v32 }
 0x172   : > { %270 = vst [vmem:[%s269_s6] sm:$0x1] %v268_v28 }
 0x173   :  { %1101 = vmatpush3.bf16.msra.mxu1 %v1236_v32 }
 0x174   :  { %1102 = vmatprep.subr.bf16.mxu1 %v1237_v36 }
 0x177   :  { %1103 = vmatpush3.bf16.msra.mxu1 %v1237_v36 }
 0x178   :  { %1104 = vmatprep.subr.bf16.mxu1 %v1238_v37 }
 0x179   :  { %v271_v33 = vld [vmem:[#allocation3] sm:$0xff]  ;;  %v272_v34 = vld [vmem:[#allocation3 + $0x8] sm:$0xff]  ;;  %v273_v40 = vld [vmem:[#allocation3 + $0x10] sm:$0xff] }
 0x17a   :  { %v274_v35 = vpack.c.bf16 %v272_v34, %v271_v33  ;;  %v275_v41 = vpack.c.bf16 %v273_v40, %v273_v40 }
 0x17b   :  { %1105 = vmatpush3.bf16.msra.mxu1 %v1238_v37 }
 0x17c   :  { %1110 = vmatprep.mubr.bf16.mxu1 %v274_v35  ;;  %1106 = vmatprep.subr.bf16.mxu1 %v1239_v38 }
 0x17f   :  { %1107 = vmatpush3.bf16.msra.mxu1 %v1239_v38 }
 0x180   :  { %1108 = vmatprep.subr.bf16.mxu1 %v1240_v39 }
 0x183   :  { %1109 = vmatpush3.bf16.msra.mxu1 %v1240_v39 }
 0x186   :  { %1111 = vmatmul.mubr.bf16.vlgmr.msra.gmra.mrb[0].mxu1 %v275_v41 }
 0x259   :  { %v1112_v42 = vpop.f32.mrb[0].mxu1 }
 0x25a   :  { %v390_v43 = vadd.f32 %v1112_v42, %v1599_v11  ;;  %v374_v44 = vpop.f32.mrb[1].mxu1 }
 0x25b   :  { %v388_v45 = vadd.f32 %v374_v44, %v1602_v13  ;;  %v1113_v46 = vpop.f32.mrb[2].mxu1 }
 0x25c   :  { %v393_v47 = vmax.f32 %v390_v43, 0.0  ;;  %v377_v48 = vpop.f32.mrb[3].mxu1 }
 0x25d   :  { %v391_v49 = vmax.f32 %v388_v45, 0.0  ;;  %v389_v50 = vadd.f32 %v377_v48, %v1605_v16 }
 0x25e   :  { %396 = vst [vmem:[#allocation2 + $0x10] sm:$0xff] %v393_v47 }
 0x25f   :  { %394 = vst [vmem:[#allocation2] sm:$0xff] %v391_v49  ;;  %v392_v51 = vmax.f32 %v389_v50, 0.0 }
 0x261   :  { %395 = vst [vmem:[#allocation2 + $0x8] sm:$0xff] %v392_v51 }
 0x262 LB: > { %s403_s7 = smul.u32 6, %s1432_s22  ;;  %s432_s18 = scalar_lea.vmem [#allocation3], %s1432_s22  ;;  %s1432_s22 = sphi %s1621_s22, %s402_s22  }
 0x263   : > { %s402_s22 = sadd.s32 1, %s1432_s22  }
 0x264   : > { %s404_s25 = sld [smem:[#allocation6 + %s403_s7]]  ;;  %s407_s8 = sadd.s32 1, %s403_s7 }
 0x265   : > { %s408_s13 = sld [smem:[#allocation6 + %s407_s8]]  ;;  %s412_s14 = sadd.s32 2, %s403_s7 }
 0x266   : > { %s413_s26 = sld [smem:[#allocation6 + %s412_s14]]  ;;  %s417_s27 = sadd.s32 3, %s403_s7 }
 0x267   : > { %s418_s2 = sld [smem:[#allocation6 + %s417_s27]]  ;;  %s422_s28 = sadd.s32 4, %s403_s7 }
 0x268   : > { %s423_s29 = sld [smem:[#allocation6 + %s422_s28]]  ;;  %s427_s30 = sadd.s32 5, %s403_s7 }
 0x269   : > { %s428_s11 = sld [smem:[#allocation6 + %s427_s30]]  ;;  %p399_p1 = scmp.ge.s32.totalorder %s402_s22, 19  }
 0x26a   : > { %s405_s12 = scalar_lea.vmem [#allocation2], %s404_s25  ;;  %v1241_v63 = vld [vmem:[#allocation11] sm:$0xff] (%p399_p1)   ;;  %v1242_v1 = vld [vmem:[#allocation11 + $0x8] sm:$0xff] (%p399_p1)   ;;  %v1243_v2 = vld [vmem:[#allocation11 + $0x10] sm:$0xff] (%p399_p1)   ;;  %s1634_s19 = smov (%p399_p1), 0  }
 0x26b   : > { %v406_v52 = vld [vmem:[%s405_s12] sm:$0x1]  ;;  %s409_s15 = scalar_lea.vmem [#allocation2], %s408_s13  ;;  %1114 = vmatprep.subr.bf16.mxu0 (%p399_p1), %v1241_v63  ;;  %v1244_v3 = vld [vmem:[#allocation11 + $0x18] sm:$0xff] (%p399_p1)   ;;  %v1246_v8 = vld [vmem:[#allocation11 + $0x28] sm:$0xff] (%p399_p1)  }
 0x26c   : > { %v410_v53 = vld [vmem:[%s409_s15] sm:$0x1]  ;;  %s414_s16 = scalar_lea.vmem [#allocation2], %s413_s26  ;;  %1115 = vmatpush3.bf16.msra.mxu0 (%p399_p1), %v1241_v63  ;;  %v1247_v9 = vld [vmem:[#allocation11 + $0x30] sm:$0xff] (%p399_p1)   ;;  %v1248_v10 = vld [vmem:[#allocation11 + $0x38] sm:$0xff] (%p399_p1)  }
 0x26d   : > { %v411_v54 = vadd.f32 %v410_v53, %v406_v52  ;;  %v415_v55 = vld [vmem:[%s414_s16] sm:$0x1]  ;;  %s419_s17 = scalar_lea.vmem [#allocation2], %s418_s2  ;;  %1116 = vmatprep.subr.bf16.mxu0 (%p399_p1), %v1242_v1 }
 0x26e   : > { %v420_v56 = vld [vmem:[%s419_s17] sm:$0x1]  ;;  %s424_s5 = scalar_lea.vmem [#allocation2], %s423_s29 }
 0x26f   : > { %v416_v57 = vadd.f32 %v415_v55, %v411_v54  ;;  %v425_v58 = vld [vmem:[%s424_s5] sm:$0x1]  ;;  %s429_s24 = scalar_lea.vmem [#allocation2], %s428_s11 }
 0x270   : > { %v430_v60 = vld [vmem:[%s429_s24] sm:$0x1]  ;;  %1117 = vmatpush3.bf16.msra.mxu0 (%p399_p1), %v1242_v1 }
 0x271   : > { %v421_v59 = vadd.f32 %v420_v56, %v416_v57  ;;  %401 = sbr.rel (!%p399_p1) target bundleno = 610 (0x262), region = 121  ;;  %1118 = vmatprep.subr.bf16.mxu0 (%p399_p1), %v1243_v2  ;;  %v1245_v7 = vld [vmem:[#allocation11 + $0x20] sm:$0xff] (%p399_p1)  }
 0x273   : > { %v426_v61 = vadd.f32 %v425_v58, %v421_v59 }
 0x274   :  { %1119 = vmatpush3.bf16.msra.mxu0 (%p399_p1), %v1243_v2 }
 0x275   : > { %v431_v62 = vadd.f32 %v430_v60, %v426_v61  ;;  %1120 = vmatprep.subr.bf16.mxu0 (%p399_p1), %v1244_v3 }
 0x277   : > { %433 = vst [vmem:[%s432_s18] sm:$0x1] %v431_v62 }
 0x278   :  { %1121 = vmatpush3.bf16.msra.mxu0 %v1244_v3 }
 0x279   :  { %1122 = vmatprep.subr.bf16.mxu0 %v1245_v7 }
 0x27c   :  { %1123 = vmatpush3.bf16.msra.mxu0 %v1245_v7 }
 0x27d   :  { %1124 = vmatprep.subr.bf16.mxu0 %v1246_v8 }
 0x27e   :  { %v434_v4 = vld [vmem:[#allocation3] sm:$0xff]  ;;  %v435_v5 = vld [vmem:[#allocation3 + $0x8] sm:$0xff]  ;;  %v436_v12 = vld [vmem:[#allocation3 + $0x10] sm:$0xff] }
 0x27f   :  { %v437_v6 = vpack.c.bf16 %v435_v5, %v434_v4  ;;  %v438_v14 = vpack.c.bf16 %v436_v12, %v436_v12 }
 0x280   :  { %1125 = vmatpush3.bf16.msra.mxu0 %v1246_v8 }
 0x281   :  { %1130 = vmatprep.mubr.bf16.mxu0 %v437_v6  ;;  %1126 = vmatprep.subr.bf16.mxu0 %v1247_v9 }
 0x284   :  { %1127 = vmatpush3.bf16.msra.mxu0 %v1247_v9 }
 0x285   :  { %1128 = vmatprep.subr.bf16.mxu0 %v1248_v10 }
 0x288   :  { %1129 = vmatpush3.bf16.msra.mxu0 %v1248_v10 }
 0x28b   :  { %1131 = vmatmul.mubr.bf16.vlgmr.msra.gmra.mrb[4].mxu0 %v438_v14 }
 0x35e   :  { %v1132_v15 = vpop.f32.mrb[4].mxu0 }
 0x35f   :  { %v553_v17 = vadd.f32 %v1132_v15, %v1599_v11  ;;  %v537_v18 = vpop.f32.mrb[5].mxu0 }
 0x360   :  { %v551_v19 = vadd.f32 %v537_v18, %v1602_v13  ;;  %v1133_v20 = vpop.f32.mrb[6].mxu0 }
 0x361   :  { %v556_v21 = vmax.f32 %v553_v17, 0.0  ;;  %v540_v22 = vpop.f32.mrb[7].mxu0 }
 0x362   :  { %v554_v23 = vmax.f32 %v551_v19, 0.0  ;;  %v552_v24 = vadd.f32 %v540_v22, %v1605_v16 }
 0x363   :  { %559 = vst [vmem:[#allocation2 + $0x10] sm:$0xff] %v556_v21 }
 0x364   :  { %557 = vst [vmem:[#allocation2] sm:$0xff] %v554_v23  ;;  %v555_v25 = vmax.f32 %v552_v24, 0.0 }
 0x366   :  { %558 = vst [vmem:[#allocation2 + $0x8] sm:$0xff] %v555_v25 }
 0x367 LB: > { %s566_s20 = smul.u32 6, %s1436_s19  ;;  %s595_s11 = scalar_lea.vmem [#allocation4], %s1436_s19  ;;  %s1436_s19 = sphi %s1634_s19, %s565_s19  }
 0x368   : > { %s565_s19 = sadd.s32 1, %s1436_s19  }
 0x369   : > { %s567_s21 = sld [smem:[#allocation7 + %s566_s20]]  ;;  %s570_s0 = sadd.s32 1, %s566_s20 }
 0x36a   : > { %s571_s1 = sld [smem:[#allocation7 + %s570_s0]]  ;;  %s575_s23 = sadd.s32 2, %s566_s20 }
 0x36b   : > { %s576_s6 = sld [smem:[#allocation7 + %s575_s23]]  ;;  %s580_s22 = sadd.s32 3, %s566_s20 }
 0x36c   : > { %s581_s7 = sld [smem:[#allocation7 + %s580_s22]]  ;;  %s585_s25 = sadd.s32 4, %s566_s20 }
 0x36d   : > { %s586_s8 = sld [smem:[#allocation7 + %s585_s25]]  ;;  %s590_s13 = sadd.s32 5, %s566_s20 }
 0x36e   : > { %s591_s14 = sld [smem:[#allocation7 + %s590_s13]]  ;;  %p562_p2 = scmp.ge.s32.totalorder %s565_s19, 13  }
 0x36f   : > { %s568_s26 = scalar_lea.vmem [#allocation2], %s567_s21  ;;  %1134 = vmatprep.subr.bf16.mxu1 (%p562_p2), %v1446_v0  ;;  %1154 = vmatprep.subr.bf16.mxu0 (%p562_p2), %v1446_v0  ;;  %v1253_v34 = vld [vmem:[#allocation14] sm:$0xff] (%p562_p2)   ;;  %vm1447_vm0 = vmmov (%p562_p2), 0   ;;  %v1255_v36 = vld [vmem:[#allocation14 + $0x8] sm:$0xff] (%p562_p2)   ;;  %v1448_v37 = vmov (%p562_p2), 0   ;;  %v1449_v39 = vmov (%p562_p2), 2   ;;  %v829_v59 = vlaneseq (%p562_p2) }
 0x370   : > { %v569_v11 = vld [vmem:[%s568_s26] sm:$0x1]  ;;  %s572_s27 = scalar_lea.vmem [#allocation2], %s571_s1  ;;  %1150 = vmatprep.mubr.msk.bf16.mxu1 (%p562_p2), %vm1447_vm0, %v1446_v0  ;;  %1170 = vmatprep.mubr.msk.bf16.mxu0 (%p562_p2), %vm1447_vm0, %v1446_v0  ;;  %v1256_v38 = vld [vmem:[#allocation13 + $0x8] sm:$0xff] (%p562_p2)   ;;  %v1257_v40 = vld [vmem:[#allocation14 + $0x10] sm:$0xff] (%p562_p2)   ;;  %v1450_v50 = vmov (%p562_p2), 1  }
 0x371   : > { %v573_v13 = vld [vmem:[%s572_s27] sm:$0x1]  ;;  %s577_s2 = scalar_lea.vmem [#allocation2], %s576_s6  ;;  %1135 = vmatpush3.bf16.msra.mxu1 (%p562_p2), %v1253_v34  ;;  %1249 = vset.pattern.permute.xlu0 (%p562_p2), %v1448_v37  ;;  %v1258_v41 = vld [vmem:[#allocation13 + $0x10] sm:$0xff] (%p562_p2)   ;;  %v1259_v42 = vld [vmem:[#allocation14 + $0x18] sm:$0xff] (%p562_p2)   ;;  %v1451_v58 = vmov (%p562_p2), 0.0|0.0  }
 0x372   : > { %v574_v16 = vadd.f32 %v573_v13, %v569_v11  ;;  %v578_v26 = vld [vmem:[%s577_s2] sm:$0x1]  ;;  %s582_s28 = scalar_lea.vmem [#allocation2], %s581_s7  ;;  %1136 = vmatprep.subr.bf16.mxu1 (%p562_p2), %v1446_v0  ;;  %1251 = vset.pattern.permute.xlu1 (%p562_p2), %v1449_v39  ;;  %v1260_v43 = vld [vmem:[#allocation13 + $0x18] sm:$0xff] (%p562_p2)   ;;  %v1263_v47 = vld [vmem:[#allocation14 + $0x28] sm:$0xff] (%p562_p2)   ;;  %v830_v62 = vand.u32 (%p562_p2), 127, %v829_v59 }
 0x373   : > { %v583_v27 = vld [vmem:[%s582_s28] sm:$0x1]  ;;  %s587_s29 = scalar_lea.vmem [#allocation2], %s586_s8  ;;  %v1264_v48 = vld [vmem:[#allocation13 + $0x28] sm:$0xff] (%p562_p2)   ;;  %v1265_v49 = vld [vmem:[#allocation14 + $0x30] sm:$0xff] (%p562_p2)   ;;  %vm850_vm4 = vcmask (%p562_p2), 130048  }
 0x374   : > { %v579_v28 = vadd.f32 %v578_v26, %v574_v16  ;;  %v588_v29 = vld [vmem:[%s587_s29] sm:$0x1]  ;;  %s592_s30 = scalar_lea.vmem [#allocation2], %s591_s14  ;;  %v1266_v51 = vld [vmem:[#allocation13 + $0x30] sm:$0xff] (%p562_p2)   ;;  %v1267_v52 = vld [vmem:[#allocation14 + $0x38] sm:$0xff] (%p562_p2)   ;;  %v831_v10 = vcvt.s32.f32 (%p562_p2), %v830_v62 }
 0x375   : > { %v593_v31 = vld [vmem:[%s592_s30] sm:$0x1]  ;;  %1137 = vmatpush3.bf16.msra.mxu1 (%p562_p2), %v1255_v36  ;;  %v1268_v55 = vld [vmem:[#allocation13 + $0x38] sm:$0xff] (%p562_p2)  }
 0x376   : > { %v584_v30 = vadd.f32 %v583_v27, %v579_v28  ;;  %564 = sbr.rel (!%p562_p2) target bundleno = 871 (0x367), region = 132  ;;  %v1254_v35 = vld [vmem:[#allocation13] sm:$0xff] (%p562_p2)   ;;  %1138 = vmatprep.subr.bf16.mxu1 (%p562_p2), %v1446_v0 }
 0x377   :  { %1155 = vmatpush3.bf16.msra.mxu0 (%p562_p2), %v1254_v35  ;;  %v1261_v44 = vld [vmem:[#allocation14 + $0x20] sm:$0xff] (%p562_p2)  }
 0x378   : > { %v589_v32 = vadd.f32 %v588_v29, %v584_v30  ;;  %1156 = vmatprep.subr.bf16.mxu0 (%p562_p2), %v1446_v0  ;;  %v1262_v45 = vld [vmem:[#allocation13 + $0x20] sm:$0xff] (%p562_p2)  }
 0x379   :  { %1139 = vmatpush3.bf16.msra.mxu1 (%p562_p2), %v1257_v40  ;;  %v832_v46 = vld [vmem:[%s1690_s4] sm:$0xff] (%p562_p2) }
 0x37a   : > { %v594_v33 = vadd.f32 %v593_v31, %v589_v32  ;;  %1140 = vmatprep.subr.bf16.mxu1 (%p562_p2), %v1446_v0  ;;  %835 = vperm.xlu0 (%p562_p2), %1249, %v832_v46   ;;  %v1269_v57 = vld [vmem:[%s1689_s3] sm:$0xff] (%p562_p2)   ;;  %s1452_s3 = smov (%p562_p2), [#allocation16]  }
 0x37b   :  { %1157 = vmatpush3.bf16.msra.mxu0 (%p562_p2), %v1256_v38  ;;  %846 = vperm.xlu1 (%p562_p2), %1251, %v832_v46   ;;  %v1021_v1 = vld [vmem:[%s1695_s9] ss:$0 sm:$0xff] (%p562_p2)  ;;  %s931_s9 = sshll.u32 (%p562_p2), %s1452_s3, 4  ;;  %s932_s9 = int_to_ptr.vmem [resolvable:$true] %s931_s9 }
 0x37c   : > { %596 = vst [vmem:[%s595_s11] sm:$0x1] %v594_v33  ;;  %1158 = vmatprep.subr.bf16.mxu0 (%p562_p2), %v1446_v0  ;;  %s1382_s24 = scalar_lea.vmem (%p562_p2), %s932_s9, 128  ;;  %p1387_p4 = scmp.lt.s32.totalorder (%p562_p2), %s932_s9, %s932_s9 }
 0x37d   :  { %1141 = vmatpush3.bf16.msra.mxu1 %v1259_v42  ;;  %p1383_p3 = scmp.ne.s32.totalorder %s932_s9, %s1382_s24  ;;  %p1388_p5 = scmp.lt.s32.totalorder %s1382_s24, %s1382_s24 }
 0x37e   :  { %1142 = vmatprep.subr.bf16.mxu1 %v1446_v0  ;;  %1250 = vset.pattern.permute.xlu0 %v1450_v50 }
 0x37f   :  { %1159 = vmatpush3.bf16.msra.mxu0 %v1258_v41  ;;  %840 = vperm.xlu0 %1250, %v832_v46   ;;  %p1389_p6 = por %p1388_p5, %p1387_p4 }
 0x380   :  { %1160 = vmatprep.subr.bf16.mxu0 %v1446_v0 }
 0x381   :  { %1143 = vmatpush3.bf16.msra.mxu1 %v1261_v44  ;;  %p1390_p7 = pnand %p1389_p6, %p1383_p3 }
 0x382   :  { %1144 = vmatprep.subr.bf16.mxu1 %v1446_v0 }
 0x383   :  { %1161 = vmatpush3.bf16.msra.mxu0 %v1260_v43  ;;  %v615_v53 = vld [vmem:[#allocation4] sm:$0xff]  ;;  %v616_v54 = vld [vmem:[#allocation4 + $0x8] sm:$0xff]  ;;  %1252 = vset.pattern.permute.xlu0 %v1449_v39 }
 0x384   :  { %1162 = vmatprep.subr.bf16.mxu0 %v1446_v0  ;;  %v617_v56 = vpack.c.bf16 %v616_v54, %v615_v53 }
 0x385   :  { %1145 = vmatpush3.bf16.msra.mxu1 %v1263_v47 }
 0x386   :  { %1146 = vmatprep.subr.bf16.mxu1 %v1446_v0 }
 0x387   :  { %1163 = vmatpush3.bf16.msra.mxu0 %v1262_v45 }
 0x388   :  { %1164 = vmatprep.subr.bf16.mxu0 %v1446_v0 }
 0x389   :  { %1147 = vmatpush3.bf16.msra.mxu1 %v1265_v49 }
 0x38a   :  { %1148 = vmatprep.subr.bf16.mxu1 %v1446_v0 }
 0x38b   :  { %1165 = vmatpush3.bf16.msra.mxu0 %v1264_v48 }
 0x38c   :  { %1166 = vmatprep.subr.bf16.mxu0 %v1446_v0 }
 0x38d   :  { %1149 = vmatpush3.bf16.msra.mxu1 %v1267_v52 }
 0x38e   :  { %1181 = vmatprep.subr.bf16.mxu1 %v1451_v58 }
 0x38f   :  { %1167 = vmatpush3.bf16.msra.mxu0 %v1266_v51 }
 0x390   :  { %1168 = vmatprep.subr.bf16.mxu0 %v1446_v0  ;;  %1151 = vmatmul.mubr.bf16.vlgmr.msra.gmra.mrb[4].mxu1 %v617_v56 }
 0x391   :  { %1178 = vmatprep.mubr.msk.f32.mxu1 %vm1447_vm0, %v1446_v0 }
 0x393   :  { %1169 = vmatpush3.bf16.msra.mxu0 %v1268_v55 }
 0x396   :  { %1171 = vmatmul.mubr.bf16.vlgmr.msra.gmra.mrb[8].mxu0 %v1269_v57 }
 0x3f9   :  { %v836_v60 = vpop.permute.xlu0 %835 }
 0x3fa   :  { %vm838_vm1 = vcmp.ge.f32.partialorder %v831_v10, %v836_v60  ;;  %v847_v19 = vpop.permute.xlu1 %846 }
 0x3fe   :  { %v841_v12 = vpop.permute.xlu0 %840 }
 0x3ff   :  { %vm843_vm2 = vcmp.lt.f32.partialorder %v831_v10, %v841_v12 }
 0x400   :  { %vm844_vm3 = vmand %vm838_vm1, %vm843_vm2 }
 0x401   :  { %v849_v20 = vsel %vm844_vm3, %v847_v19, 0.0 }
 0x463   :  { %v716_v61 = vpop.f32.mrb[4].mxu1 }
 0x464   :  { %v1152_v2 = vpop.f32.mrb[5].mxu1 }
 0x465   :  { %v719_v5 = vpop.f32.mrb[6].mxu1 }
 0x466   :  { %v1153_v7 = vpop.f32.mrb[7].mxu1 }
 0x469   :  { %v811_v63 = vpop.f32.mrb[8].mxu0 }
 0x46a   :  { %v812_v3 = vadd.f32 %v811_v63, %v716_v61  ;;  %v1172_v4 = vpop.f32.mrb[9].mxu0 }
 0x46b   :  { %v814_v6 = vpop.f32.mrb[10].mxu0 }
 0x46c   :  { %v825_v8 = vadd.f32 %v1021_v1, %v812_v3  ;;  %v815_v9 = vadd.f32 %v814_v6, %v719_v5  ;;  %v1173_v0 = vpop.f32.mrb[11].mxu0 }
 0x46e   :  { %v826_v14 = vadd.f32 %v1021_v1, %v815_v9  ;;  %v827_v15 = vmax.f32 %v825_v8, 0.0 }
 0x470   :  { %v828_v17 = vmax.f32 %v826_v14, 0.0 }
 0x472   :  { %v1182_v18 = vpack.c.bf16 %v828_v17, %v827_v15 }
 0x474   :  { %1183 = vmatpush3.bf16.msra.mxu1 %v1182_v18 }
 0x477   :  { %1179 = vmatmul.mubr.msk.f32.vlgmr.msra.gmra.mrb[8].mxu1 %vm850_vm4, %v849_v20 }
 0x54a   :  { %v920_v21 = vpop.f32.mrb[8].mxu1 }
 0x54b   :  { %924 = vst [vmem:[#allocation16] sm:$0xff] %v920_v21  ;;  %v1180_v22 = vpop.f32.mrb[9].mxu1 }
 0x54c   :  { %1393 = shalt.err (!%p1390_p7)
}
 0x54d   :  { %s1394_s20 = scalar_lea.hbm %s1696_s10, 128 }
 0x54e   :  { %p1395_p8 = scmp.ne.s32.totalorder %s1696_s10, %s1394_s20  ;;  %p1398_p9 = scmp.lt.u32.totalorder %s1394_s20, %s1696_s10 }
 0x550   :  { %p1400_p10 = pnand %p1398_p9, %p1395_p8 }
 0x552   :  { %1403 = shalt.err (!%p1400_p10)
}
 0x553   :  { %934 = dma.vmem_to_hbm [thread:$0]  %s932_s9, 128, %s1696_s10, [#allocation10]  }
 0x554   :  { %1424 = dma.done.wait [#allocation10], 128  }
 0x555   :  { %1425 = vsyncadd [#allocation10], 4294967168 }
 0x556   :  { %938 = vsyncpa [#allocation9], 1 }
 0x557   :  { %939 = vsyncpa [#allocation12], 1 }
 0x558   :  { %940 = vsyncpa [#allocation15], 1 }
 0x559   :  { %941 = vsyncpa [#allocation10], 1 }

</bundles_post_ra>
